<compile_context>
chip_gen: v5e
topology: v5e:2x2
jax: 0.10.0
libtpu: 0.0.40
codegen_flags: <defaults>
</compile_context>

<pallas_src>
import functools

import jax
import jax.numpy as jnp
from jax import lax
from jax.experimental import pallas as pl
from jax.experimental.pallas import tpu as pltpu


def _combined_loss_kernel(d_ref, l_ref, o_ref, acc_ref, *,
                          rows, tile_rows, steps_per_core, inv_n, need_mask):
    c = pl.program_id(0)          # core (parallel) axis
    i = pl.program_id(1)          # streaming (arbitrary/reduction) axis

    @pl.when(i == 0)
    def _():
        acc_ref[...] = jnp.zeros_like(acc_ref)

    d = d_ref[...]
    l = l_ref[...]
    if d.dtype != jnp.float32:     # skip no-op casts for f32 inputs
        d = d.astype(jnp.float32)
    if l.dtype != jnp.float32:
        l = l.astype(jnp.float32)
    diff = d - l

    def _partial(dv):
        adiff = jnp.abs(dv)
        sq = dv * dv
        sl = jnp.where(adiff < 1.0, 0.5 * sq, adiff - 0.5)
        # Fused per-element contribution of all three losses; lane-parallel
        # partial sum (VPU) accumulated in VMEM.
        return jnp.sum(sq + adiff + sl, axis=0, keepdims=True)

    if need_mask:
        g = c * steps_per_core + i          # global block index (unclamped)
        row0 = g * tile_rows
        is_tail = row0 + tile_rows > rows   # block extends past valid rows

        def _masked(_):
            ridx = row0 + lax.broadcasted_iota(jnp.int32, (tile_rows, 1), 0)
            # select (not multiply) so NaN/Inf garbage in padded rows is safe
            return _partial(jnp.where(ridx < rows, diff, 0.0))

        def _unmasked(_):
            return _partial(diff)

        part = lax.cond(is_tail, _masked, _unmasked, None)
    else:
        part = _partial(diff)

    acc_ref[...] += part

    @pl.when(i == pl.num_programs(1) - 1)
    def _():
        # Single cross-lane reduce + pre-scaled scalar write per core.
        o_ref[0, 0] = jnp.sum(acc_ref[...]) * inv_n


def _elem_contrib(d, l):
    d = d.astype(jnp.float32)
    l = l.astype(jnp.float32)
    diff = d - l
    adiff = jnp.abs(diff)
    sq = diff * diff
    return sq + adiff + jnp.where(adiff < 1.0, 0.5 * sq, adiff - 0.5)


def _choose_lane(n):
    for lane in (512, 256, 128):
        if n % lane == 0:
            return lane
    return 128


def _tpu_config():
    kind = ""
    try:
        kind = jax.devices()[0].device_kind.lower()
    except Exception:
        pass
    is_v7 = ("v7" in kind) or ("7x" in kind)
    num_cores = 2 if is_v7 else 1
    # Elements per input per pipeline buffer (dtype-independent element count):
    # 8 MiB f32/input on v5e/v6e, 4 MiB f32/input on v7x (64 MiB VMEM per TC).
    block_elems = (1 << 20) if is_v7 else (2 << 20)
    return num_cores, block_elems


def combined_loss(data, label):
    """Sum of MSE + L1 + SmoothL1 (each mean-reduced), PyTorch semantics."""
    assert data.shape == label.shape
    n = int(data.size)
    inv_n = 1.0 / float(n)

    flat_d = data.reshape(-1)       # free metadata reshape (contiguous)
    flat_l = label.reshape(-1)

    main_n = (n // 128) * 128
    rem = n - main_n

    tail = jnp.float32(0.0)
    if rem:
        # <128-element tail handled in plain JAX (no zero-pad concat copy).
        # TODO(synk): the prefix slice below may still materialize a copy in
        # XLA; a fully copy-free ragged path would need a manual-DMA kernel.
        tail = jnp.sum(_elem_contrib(flat_d[main_n:], flat_l[main_n:]))
        flat_d = flat_d[:main_n]
        flat_l = flat_l[:main_n]

    if main_n == 0:
        return tail * inv_n

    lane = _choose_lane(main_n)
    rows = main_n // lane
    d2 = flat_d.reshape(rows, lane)     # free reshape, lane-dense slab
    l2 = flat_l.reshape(rows, lane)

    num_cores, block_elems = _tpu_config()
    itemsize = jnp.dtype(data.dtype).itemsize
    sub = max(8, 32 // max(itemsize, 1))    # sublane packing (8 f32, 16 bf16)
    tile_rows = max(sub, (block_elems // lane) // sub * sub)
    if tile_rows >= rows:
        tile_rows = rows                    # full-extent block (always legal)

    grid_m = pl.cdiv(rows, tile_rows)
    steps_per_core = pl.cdiv(grid_m, num_cores)
    # Mask needed iff any block (overhang or phantom per-core block) covers
    # rows beyond the array.
    need_mask = (num_cores * steps_per_core * tile_rows) != rows
    clamp = (num_cores * steps_per_core) > grid_m

    def in_idx(c, i):
        g = c * steps_per_core + i
        if clamp:
            # Phantom blocks on the last core re-read the final valid block
            # (in-bounds DMA); their contribution is fully masked to zero.
            g = jnp.minimum(g, grid_m - 1)
        return (g, 0)

    in_block_bytes = tile_rows * lane * itemsize
    f32_block_bytes = tile_rows * lane * 4
    # 2 inputs x 2 pipeline buffers + generous f32 working-set margin.
    vmem_limit = int(min(4 * in_block_bytes + 4 * f32_block_bytes
                         + 8 * 1024 * 1024,
                         100 * 1024 * 1024))

    kernel = functools.partial(
        _combined_loss_kernel, rows=rows, tile_rows=tile_rows,
        steps_per_core=steps_per_core, inv_n=inv_n, need_mask=need_mask)

    partials = pl.pallas_call(
        kernel,
        out_shape=jax.ShapeDtypeStruct((num_cores, 1), jnp.float32),
        grid_spec=pltpu.PrefetchScalarGridSpec(
            num_scalar_prefetch=0,
            grid=(num_cores, steps_per_core),
            in_specs=[
                pl.BlockSpec((tile_rows, lane), in_idx),
                pl.BlockSpec((tile_rows, lane), in_idx),
            ],
            out_specs=pl.BlockSpec((1, 1), lambda c, i: (c, 0),
                                   memory_space=pltpu.SMEM),
            scratch_shapes=[pltpu.VMEM((1, lane), jnp.float32)],
        ),
        compiler_params=pltpu.CompilerParams(
            dimension_semantics=("parallel", "arbitrary"),
            vmem_limit_bytes=vmem_limit,
        ),
        cost_estimate=pl.CostEstimate(
            flops=10 * main_n,
            transcendentals=0,
            bytes_accessed=2 * main_n * itemsize + 4 * num_cores),
    )(d2, l2)

    total = partials[0, 0] if num_cores == 1 else jnp.sum(partials)
    if rem:
        total = total + tail * inv_n
    return total


def _reference(data, label):
    d = data.astype(jnp.float32)
    l = label.astype(jnp.float32)
    diff = d - l
    adiff = jnp.abs(diff)
    mse = jnp.mean(diff * diff)
    l1 = jnp.mean(adiff)
    sl1 = jnp.mean(jnp.where(adiff < 1.0, 0.5 * diff * diff, adiff - 0.5))
    return mse + l1 + sl1


if __name__ == "__main__":
    key = jax.random.PRNGKey(0)
    k1, k2 = jax.random.split(key)
    # NCHW, matching PyTorch conv-style inputs.
    data = jax.random.normal(k1, (2, 4, 16, 16), dtype=jnp.float32)
    label = jax.random.normal(k2, (2, 4, 16, 16), dtype=jnp.float32)

    loss_fn = jax.jit(combined_loss)
    out = loss_fn(data, label)
    out = jax.block_until_ready(out)

    ref = _reference(data, label)
    assert jnp.allclose(out, ref, rtol=1e-5, atol=1e-5), (out, ref)
    print("KERNEL_OK")
</pallas_src>

<mosaic_0001>
module attributes {stable_mosaic.version = 11 : i64} {
  func.func @_combined_loss_kernel(%arg0: i32, %arg1: i32, %arg2: memref<4x512xf32, #tpu.memory_space<vmem>>, %arg3: memref<4x512xf32, #tpu.memory_space<vmem>>, %arg4: memref<1x1xf32, #tpu.memory_space<smem>>, %arg5: memref<1x512xf32, #tpu.memory_space<vmem>>) attributes {dimension_semantics = [#tpu.dimension_semantics<parallel>, #tpu.dimension_semantics<arbitrary>], iteration_bounds = array<i64: 1, 1>, scalar_prefetch = 0 : i64, scratch_operands = 1 : i64, tpu.core_type = #tpu.core_type<tc>, window_params = [{transform_indices = @transform_0, window_bounds = array<i64: 4, 512>}, {transform_indices = @transform_1, window_bounds = array<i64: 4, 512>}, {transform_indices = @transform_2, window_bounds = array<i64: 1, 1>}]} {
    %c0_i32 = arith.constant 0 : i32
    %0 = arith.cmpi eq, %arg1, %c0_i32 : i32
    %1 = arith.extui %0 : i1 to i32
    %c0_i32_0 = arith.constant 0 : i32
    %2 = arith.cmpi ne, %1, %c0_i32_0 : i32
    scf.if %2 {
      %cst_13 = arith.constant 0.000000e+00 : f32
      %25 = vector.broadcast %cst_13 : f32 to vector<1x512xf32>
      %c0_14 = arith.constant 0 : index
      %c0_15 = arith.constant 0 : index
      %26 = vector.load %arg5[%c0_14, %c0_15] : memref<1x512xf32, #tpu.memory_space<vmem>>, vector<1x512xf32>
      tpu.vector_store %arg5[%c0_14, %c0_15], %25 {strides = array<i32>} : memref<1x512xf32, #tpu.memory_space<vmem>>, vector<1x512xf32>,
    } else {
    }
    %c0 = arith.constant 0 : index
    %c0_1 = arith.constant 0 : index
    %3 = vector.load %arg2[%c0, %c0_1] : memref<4x512xf32, #tpu.memory_space<vmem>>, vector<4x512xf32>
    %c0_2 = arith.constant 0 : index
    %c0_3 = arith.constant 0 : index
    %4 = vector.load %arg3[%c0_2, %c0_3] : memref<4x512xf32, #tpu.memory_space<vmem>>, vector<4x512xf32>
    %5 = arith.subf %3, %4 : vector<4x512xf32>
    %6 = math.absf %5 : vector<4x512xf32>
    %7 = arith.mulf %5, %5 : vector<4x512xf32>
    %cst = arith.constant 1.000000e+00 : f32
    %8 = vector.broadcast %cst : f32 to vector<4x512xf32>
    %9 = arith.cmpf olt, %6, %8 : vector<4x512xf32>
    %cst_4 = arith.constant 5.000000e-01 : f32
    %10 = vector.broadcast %cst_4 : f32 to vector<4x512xf32>
    %11 = arith.mulf %10, %7 : vector<4x512xf32>
    %cst_5 = arith.constant 5.000000e-01 : f32
    %12 = vector.broadcast %cst_5 : f32 to vector<4x512xf32>
    %13 = arith.subf %6, %12 : vector<4x512xf32>
    %14 = arith.select %9, %11, %13 : vector<4x512xi1>, vector<4x512xf32>
    %15 = arith.addf %7, %6 : vector<4x512xf32>
    %16 = arith.addf %15, %14 : vector<4x512xf32>
    %cst_6 = arith.constant dense<0.000000e+00> : vector<512xf32>
    %17 = vector.multi_reduction <add>, %16, %cst_6 [0] : vector<4x512xf32> to vector<512xf32>
    %18 = vector.shape_cast %17 : vector<512xf32> to vector<1x512xf32>
    %c0_7 = arith.constant 0 : index
    %c0_8 = arith.constant 0 : index
    %19 = vector.load %arg5[%c0_7, %c0_8] : memref<1x512xf32, #tpu.memory_space<vmem>>, vector<1x512xf32>
    %20 = arith.addf %19, %18 : vector<1x512xf32>
    %c0_9 = arith.constant 0 : index
    %c0_10 = arith.constant 0 : index
    %21 = vector.load %arg5[%c0_9, %c0_10] : memref<1x512xf32, #tpu.memory_space<vmem>>, vector<1x512xf32>
    tpu.vector_store %arg5[%c0_9, %c0_10], %20 {strides = array<i32>} : memref<1x512xf32, #tpu.memory_space<vmem>>, vector<1x512xf32>,
    %c0_i32_11 = arith.constant 0 : i32
    %22 = arith.cmpi eq, %arg1, %c0_i32_11 : i32
    %23 = arith.extui %22 : i1 to i32
    %c0_i32_12 = arith.constant 0 : i32
    %24 = arith.cmpi ne, %23, %c0_i32_12 : i32
    scf.if %24 {
      %c0_13 = arith.constant 0 : index
      %c0_14 = arith.constant 0 : index
      %25 = vector.load %arg5[%c0_13, %c0_14] : memref<1x512xf32, #tpu.memory_space<vmem>>, vector<1x512xf32>
      %26 = vector.shape_cast %25 : vector<1x512xf32> to vector<1x1x512xf32>
      %cst_15 = arith.constant dense<0.000000e+00> : vector<1xf32>
      %27 = vector.multi_reduction <add>, %26, %cst_15 [1, 2] : vector<1x1x512xf32> to vector<1xf32>
      %28 = vector.shape_cast %27 : vector<1xf32> to vector<1x1x1xf32>
      %29 = vector.extract %28[0, 0, 0] : f32 from vector<1x1x1xf32>
      %cst_16 = arith.constant 4.8828125E-4 : f32
      %30 = arith.mulf %29, %cst_16 : f32
      %c0_17 = arith.constant 0 : index
      %c0_18 = arith.constant 0 : index
      %31 = memref.load %arg4[%c0_17, %c0_18] : memref<1x1xf32, #tpu.memory_space<smem>>
      memref.store %30, %arg4[%c0_17, %c0_18] : memref<1x1xf32, #tpu.memory_space<smem>>
    } else {
    }
    return
  }
  func.func @transform_0(%arg0: i32, %arg1: i32) -> (i32, i32) {
    %c1_i32 = arith.constant 1 : i32
    %0 = arith.muli %arg0, %c1_i32 : i32
    %1 = arith.addi %0, %arg1 : i32
    %c0_i32 = arith.constant 0 : i32
    %c0_i32_0 = arith.constant 0 : i32
    return %1, %c0_i32 : i32, i32
  }
  func.func @transform_1(%arg0: i32, %arg1: i32) -> (i32, i32) {
    %c1_i32 = arith.constant 1 : i32
    %0 = arith.muli %arg0, %c1_i32 : i32
    %1 = arith.addi %0, %arg1 : i32
    %c0_i32 = arith.constant 0 : i32
    %c0_i32_0 = arith.constant 0 : i32
    return %1, %c0_i32 : i32, i32
  }
  func.func @transform_2(%arg0: i32, %arg1: i32) -> (i32, i32) {
    %c0_i32 = arith.constant 0 : i32
    %c0_i32_0 = arith.constant 0 : i32
    return %arg0, %c0_i32 : i32, i32
  }
}

</mosaic_0001>

<bundles_post_ra>
// kernel: combined_loss.1
= control target key start
LH: loop header
LB: loop body
LE: loop exit
PB: predicated region body
PF: predicated region fallthrough
CT: control target
= control target key end

     0   :  { %v56_v0 = vlaneseq  ;;  %s270_s0 = inlined_call_operand.vmem [shape: f32[4,512], index: 0, kind: input, shape index: {}]   ;;  %s271_s1 = inlined_call_operand.vmem [shape: f32[4,512], index: 1, kind: input, shape index: {}]   ;;  %s272_s2 = inlined_call_operand.hbm [shape: f32[1,1], index: 2, kind: output, shape index: {}]  }
   0x1   :  { %v61_v1 = vld [vmem:[%s270_s0] sm:$0xff]  ;;  %v62_v2 = vld [vmem:[%s270_s0 + $0x8] sm:$0xff] }
   0x2   :  { %v63_v3 = vld [vmem:[%s271_s1] sm:$0xff]  ;;  %v64_v4 = vld [vmem:[%s271_s1 + $0x8] sm:$0xff] }
   0x3   :  { %v65_v5 = vsub.f32 %v61_v1, %v63_v3 }
   0x4   :  { %7 = vsyncpa [#allocation4], 0  ;;  %vm254_vm0 = vcmp.lt.s32.totalorder %v56_v0, 512  ;;  %v66_v7 = vsub.f32 %v62_v2, %v64_v4  ;;  %v225_v8 = vmov 0.0   ;;  %vm96_vm3 = vcmask 1043456   ;;  %s183_s17 = sshll.u32 %s272_s2, 4  ;;  %s184_s17 = int_to_ptr.hbm [resolvable:$true] %s183_s17 }
   0x5   :  { %60 = vst.msk [vmem:[#allocation2] sm:$0xf] %vm254_vm0, %v225_v8  ;;  %v67_v9 = vand.u32 2147483647, %v65_v5  ;;  %v69_v10 = vmul.f32 %v65_v5, %v65_v5  ;;  %vm133_vm4 = vcmask 1040384   ;;  %vm135_vm5 = vcmask 1042434  }
   0x6   :  { %v68_v11 = vand.u32 2147483647, %v66_v7  ;;  %v70_v12 = vmul.f32 %v66_v7, %v66_v7  ;;  %vm137_vm6 = vcmask 1041408   ;;  %s226_s20 = smov [#allocation3]  }
   0x7   :  { %vm71_vm1 = vcmp.lt.f32.partialorder %v67_v9, 1.0  ;;  %v73_v13 = vmul.f32 0.5, %v69_v10  ;;  %v205_v14 = vadd.f32 -0.5, %v67_v9  ;;  %v79_v15 = vadd.f32 %v69_v10, %v67_v9 }
   0x8   :  { %vm72_vm2 = vcmp.lt.f32.partialorder %v68_v11, 1.0  ;;  %v74_v16 = vmul.f32 0.5, %v70_v12  ;;  %v206_v17 = vadd.f32 -0.5, %v68_v11  ;;  %v80_v18 = vadd.f32 %v70_v12, %v68_v11 }
   0x9   :  { %v77_v19 = vsel %vm71_vm1, %v73_v13, %v205_v14 }
   0xa   :  { %v78_v20 = vsel %vm72_vm2, %v74_v16, %v206_v17  ;;  %v81_v21 = vadd.f32 %v79_v15, %v77_v19 }
   0xb   :  { %v82_v22 = vadd.f32 %v80_v18, %v78_v20 }
   0xc   :  { %85 = vst [vmem:[#allocation1] ss:$2 sm:$0xff] %v81_v21  ;;  %v125_v58 = vld [vmem:[#allocation2] sm:$0xf] }
   0xd   :  { %87 = vst [vmem:[#allocation1 + $0x10] ss:$2 sm:$0xff] %v82_v22 }
  0x13   :  { %v88_v23 = vld.sshfl [vmem:[#allocation1] sm:$0xff pattern:$0x75316420]  ;;  %v89_v24 = vld.sshfl [vmem:[#allocation1 + $0x8] sm:$0xff pattern:$0x75316420] }
  0x14   :  { %v90_v25 = vld.sshfl [vmem:[#allocation1 + $0x10] sm:$0xff pattern:$0x75316420]  ;;  %v91_v26 = vld.sshfl [vmem:[#allocation1 + $0x18] sm:$0xff pattern:$0x75316420] }
  0x15   :  { %v97_v27 = vsel %vm96_vm3, %v88_v23, 0.0  ;;  %v104_v28 = vsel %vm96_vm3, %v89_v24, 0.0  ;;  %v111_v29 = vsel %vm96_vm3, %v90_v25, 0.0  ;;  %v118_v30 = vsel %vm96_vm3, %v91_v26, 0.0 }
  0x16   :  { %v98_v31 = vrot.slane %v97_v27, 4  ;;  %v105_v32 = vrot.slane %v104_v28, 4  ;;  %v112_v33 = vrot.slane %v111_v29, 4  ;;  %v119_v34 = vrot.slane %v118_v30, 4 }
  0x18   :  { %v99_v35 = vadd.f32 %v98_v31, %v97_v27  ;;  %v106_v36 = vadd.f32 %v105_v32, %v104_v28  ;;  %v113_v37 = vadd.f32 %v112_v33, %v111_v29  ;;  %v120_v38 = vadd.f32 %v119_v34, %v118_v30 }
  0x1a   :  { %v100_v39 = vrot.slane %v99_v35, 2  ;;  %v107_v40 = vrot.slane %v106_v36, 2  ;;  %v114_v41 = vrot.slane %v113_v37, 2  ;;  %v121_v42 = vrot.slane %v120_v38, 2 }
  0x1c   :  { %v101_v43 = vadd.f32 %v100_v39, %v99_v35  ;;  %v108_v44 = vadd.f32 %v107_v40, %v106_v36  ;;  %v115_v45 = vadd.f32 %v114_v41, %v113_v37  ;;  %v122_v46 = vadd.f32 %v121_v42, %v120_v38 }
  0x1e   :  { %v102_v47 = vrot.slane %v101_v43, 1  ;;  %v109_v48 = vrot.slane %v108_v44, 1  ;;  %v116_v49 = vrot.slane %v115_v45, 1  ;;  %v123_v50 = vrot.slane %v122_v46, 1 }
  0x20   :  { %v103_v51 = vadd.f32 %v102_v47, %v101_v43  ;;  %v110_v52 = vadd.f32 %v109_v48, %v108_v44  ;;  %v117_v53 = vadd.f32 %v116_v49, %v115_v45  ;;  %v124_v54 = vadd.f32 %v123_v50, %v122_v46 }
  0x22   :  { %v130_v55 = vrot.slane %v110_v52, 7  ;;  %v131_v56 = vrot.slane %v117_v53, 6  ;;  %v132_v57 = vrot.slane %v124_v54, 5 }
  0x24   :  { %v134_v59 = vsel %vm133_vm4, %v103_v51, %v130_v55  ;;  %v136_v60 = vsel %vm135_vm5, %v131_v56, %v132_v57 }
  0x25   :  { %v138_v61 = vsel %vm137_vm6, %v134_v59, %v136_v60 }
  0x26   :  { %v140_v62 = vadd.f32 %v138_v61, %v125_v58 }
  0x28   :  { %145 = vst.msk [vmem:[#allocation2] sm:$0xf] %vm254_vm0, %v140_v62 }
  0x2f   :  { %v149_v63 = vld [vmem:[#allocation2] sm:$0xf] }
  0x30   :  { %v151_v0 = vperm.slane %v149_v63, 0  ;;  %v152_v1 = vperm.slane %v149_v63, 1  ;;  %v153_v2 = vperm.slane %v149_v63, 2  ;;  %v154_v3 = vperm.slane %v149_v63, 3 }
  0x32   :  { %v159_v4 = vsel %vm133_vm4, %v151_v0, 0.0  ;;  %v160_v5 = vsel %vm133_vm4, %v152_v1, 0.0  ;;  %v162_v7 = vsel %vm133_vm4, %v153_v2, 0.0  ;;  %v164_v9 = vsel %vm133_vm4, %v154_v3, 0.0 }
  0x33   :  { %v161_v8 = vadd.f32 %v160_v5, %v159_v4 }
  0x35   :  { %v163_v10 = vadd.f32 %v162_v7, %v161_v8 }
  0x37   :  { %v165_v11 = vadd.f32 %v164_v9, %v163_v10 }
  0x39   :  { %166 = vadd.xlane.f32.xlu0 %v165_v11 }
  0xac   :  { %v167_v12 = vpop.xlane.xlu0 %166 }
  0xad   :  { %v168_v6 = vrot.slane %v167_v12, 4 }
  0xaf   :  { %v169_v13 = vadd.f32 %v168_v6, %v167_v12 }
  0xb1   :  { %v170_v14 = vrot.slane %v169_v13, 2 }
  0xb3   :  { %v171_v15 = vadd.f32 %v170_v14, %v169_v13 }
  0xb5   :  { %v172_v16 = vrot.slane %v171_v15, 1 }
  0xb7   :  { %v173_v17 = vadd.f32 %v172_v16, %v171_v15 }
  0xb9   :  { %207 = vpush %v173_v17 }
  0xea   :  { %s208_s18 = spop %207 }
  0xeb   :  { %s175_s19 = smul.f32 0.00048828125, %s208_s18 }
  0xed   :  { %177 = sst [smem:[#allocation3]] %s175_s19 }
  0xee   :  { %186 = dma.smem_to_hbm %s226_s20, 16, %s184_s17, [#allocation4]  }
  0xef   :  { %223 = dma.done.wait [#allocation4], 16  }
  0xf0   :  { %224 = vsyncadd [#allocation4], 4294967280 }
  0xf1   :  { %191 = sfence }
  0xf2   :  { %192 = vsyncpa [#allocation4], 1 }

</bundles_post_ra>
